<compile_context>
chip_gen: v6e
topology: v6e:2x2x1
jax: 0.10.0
libtpu: 0.0.40
codegen_flags: <defaults>
</compile_context>

<pallas_src>
import functools

import jax
import jax.numpy as jnp
from jax import lax
from jax.experimental import pallas as pl
from jax.experimental.pallas import tpu as pltpu


def _se_kernel(x_ref, w1_ref, b1_ref, w2_ref, b2_ref, o_ref, *, inv_hw):
    # x_ref block: (Bt, C, HW)
    # w1: (S, C)  b1: (1, S)  w2: (C, S)  b2: (1, C)

    # ---- squeeze: global average pool over the lane (spatial) axis.
    pooled = jnp.sum(x_ref[...], axis=2) * inv_hw             # (Bt, C)

    # ---- excitation MLP on the MXU (tiny matmuls, hidden under the DMA).
    # h[b, s] = sum_c pooled[b, c] * w1[s, c] + b1[s]
    h = lax.dot_general(pooled, w1_ref[...],
                        (((1,), (1,)), ((), ())),
                        preferred_element_type=jnp.float32)    # (Bt, S)
    h = h + b1_ref[...]
    h = h * jax.nn.sigmoid(h)                                  # SiLU

    # cal[b, c] = sigmoid(sum_s h[b, s] * w2[c, s] + b2[c])
    cal = lax.dot_general(h, w2_ref[...],
                          (((1,), (1,)), ((), ())),
                          preferred_element_type=jnp.float32)  # (Bt, C)
    cal = jax.nn.sigmoid(cal + b2_ref[...])

    # ---- re-scale: re-read the tile so the load fuses with the mul + store.
    o_ref[...] = (x_ref[...] * cal[:, :, None]).astype(o_ref.dtype)


def _tpu_vmem_and_cores():
    """Best-effort hardware query; conservative fallbacks if unavailable."""
    vmem, cores = None, None
    try:
        info = pltpu.get_tpu_info()
        vmem = getattr(info, "vmem_capacity_bytes", None)
        cores = getattr(info, "num_cores", None) or getattr(info, "core_count", None)
    except Exception:
        pass
    if not vmem:
        vmem = 64 * 1024 * 1024     # conservative: v7x has 64 MiB per TC
    if not cores:
        cores = 2                   # conservative: assume multi-TC, split work
    return int(vmem), int(cores)


def squeeze_excitation(x, w1, b1, w2, b2, *, target_block_bytes=None):
    """x: (B, C, H, W) float32; w1: (S, C); b1: (S,); w2: (C, S); b2: (C,)."""
    B, C, H, W = x.shape
    S = w1.shape[0]
    HW = H * W
    itemsize = jnp.dtype(x.dtype).itemsize

    vmem_cap, num_cores = _tpu_vmem_and_cores()

    # ~8 MiB blocks on 64-MiB-VMEM parts (v7x), ~16 MiB on 128-MiB parts.
    if target_block_bytes is None:
        target_block_bytes = (16 << 20) if vmem_cap >= (96 << 20) else (8 << 20)

    # No pad: last two dims of the block equal the full array dims (C, HW).
    x2 = x.reshape(B, C, HW)

    # ---- batch grouping: stream ~target_block_bytes of x per grid step.
    bytes_per_batch = C * HW * itemsize
    Bt = int(max(1, min(B, target_block_bytes // max(1, bytes_per_batch))))
    # TODO(synk): if a single batch row (C*HW) ever exceeds VMEM, tile HW with
    # a two-pass / accumulator scheme for the mean.

    # Keep >= num_cores grid steps only on multi-TC parts so both TensorCores
    # get work under dimension_semantics=("parallel",).
    if num_cores > 1 and Bt >= B and B >= num_cores:
        Bt = pl.cdiv(B, num_cores)

    # Prefer an exact divisor of B only if it keeps blocks near the target;
    # otherwise accept a masked trailing partial block (grid = cdiv).
    divisor = max(d for d in range(1, Bt + 1) if B % d == 0)
    if divisor * 2 >= Bt:
        Bt = divisor
    grid = (pl.cdiv(B, Bt),)
    block_bytes = Bt * bytes_per_batch

    # in + out double-buffered blocks + weights + headroom, clamped below
    # physical VMEM (v7x: 64 MiB; v5e/v6e: 128 MiB).
    vmem_limit_bytes = int(min(max(32 << 20, 4 * block_bytes + (4 << 20)),
                               vmem_cap - (8 << 20)))

    b1c = b1.reshape(1, S)
    b2c = b2.reshape(1, C)

    kernel = functools.partial(_se_kernel, inv_hw=1.0 / HW)

    cost = pl.CostEstimate(
        flops=2 * B * C * HW + 4 * B * S * C,
        transcendentals=B * (S + C),
        bytes_accessed=2 * B * C * HW * itemsize
        + (w1.size + b1.size + w2.size + b2.size) * itemsize,
    )

    out2 = pl.pallas_call(
        kernel,
        out_shape=jax.ShapeDtypeStruct((B, C, HW), x.dtype),
        grid_spec=pltpu.PrefetchScalarGridSpec(
            num_scalar_prefetch=0,
            grid=grid,
            in_specs=[
                pl.BlockSpec((Bt, C, HW), lambda b: (b, 0, 0)),  # x tile
                pl.BlockSpec((S, C), lambda b: (0, 0)),          # w1
                pl.BlockSpec((1, S), lambda b: (0, 0)),          # b1
                pl.BlockSpec((C, S), lambda b: (0, 0)),          # w2
                pl.BlockSpec((1, C), lambda b: (0, 0)),          # b2
            ],
            out_specs=pl.BlockSpec((Bt, C, HW), lambda b: (b, 0, 0)),
        ),
        compiler_params=pltpu.CompilerParams(
            dimension_semantics=("parallel",),
            vmem_limit_bytes=vmem_limit_bytes,
        ),
        cost_estimate=cost,
    )(x2, w1, b1c, w2, b2c)

    return out2.reshape(B, C, H, W)


def _reference(x, w1, b1, w2, b2):
    pooled = jnp.mean(x, axis=(2, 3))                        # (B, C)
    h = pooled @ w1.T + b1
    h = h * jax.nn.sigmoid(h)                                # SiLU
    cal = jax.nn.sigmoid(h @ w2.T + b2)                      # (B, C)
    return x * cal[:, :, None, None]


if __name__ == "__main__":
    # Shapes consistent with the module: in_channels=16 -> squeeze_channels=2.
    B, C, H, W = 2, 16, 16, 16
    S = C // 8

    key = jax.random.PRNGKey(0)
    kx, k1, k2, k3, k4 = jax.random.split(key, 5)

    x = jax.random.normal(kx, (B, C, H, W), dtype=jnp.float32)

    # Deterministic parameter init (PyTorch Linear-style uniform bounds).
    bound1 = 1.0 / jnp.sqrt(C)
    w1 = jax.random.uniform(k1, (S, C), jnp.float32, -bound1, bound1)
    b1 = jax.random.uniform(k2, (S,), jnp.float32, -bound1, bound1)
    bound2 = 1.0 / jnp.sqrt(S)
    w2 = jax.random.uniform(k3, (C, S), jnp.float32, -bound2, bound2)
    b2 = jax.random.uniform(k4, (C,), jnp.float32, -bound2, bound2)

    out = squeeze_excitation(x, w1, b1, w2, b2)
    out = jax.block_until_ready(out)

    ref = _reference(x, w1, b1, w2, b2)
    assert out.shape == (B, C, H, W)
    assert jnp.allclose(out, ref, atol=1e-5, rtol=1e-5)

    print("KERNEL_OK")
</pallas_src>

<mosaic_0001>
module attributes {stable_mosaic.version = 11 : i64} {
  func.func @_se_kernel(%arg0: i32, %arg1: memref<1x16x256xf32, #tpu.memory_space<vmem>>, %arg2: memref<2x16xf32, #tpu.memory_space<vmem>>, %arg3: memref<1x2xf32, #tpu.memory_space<vmem>>, %arg4: memref<16x2xf32, #tpu.memory_space<vmem>>, %arg5: memref<1x16xf32, #tpu.memory_space<vmem>>, %arg6: memref<1x16x256xf32, #tpu.memory_space<vmem>>) attributes {dimension_semantics = [#tpu.dimension_semantics<parallel>], iteration_bounds = array<i64: 2>, scalar_prefetch = 0 : i64, scratch_operands = 0 : i64, tpu.core_type = #tpu.core_type<tc>, window_params = [{transform_indices = @transform_0, window_bounds = array<i64: 1, 16, 256>}, {pipeline_mode = #tpu.pipeline_mode<synchronous>, transform_indices = @transform_1, window_bounds = array<i64: 2, 16>}, {pipeline_mode = #tpu.pipeline_mode<synchronous>, transform_indices = @transform_2, window_bounds = array<i64: 1, 2>}, {pipeline_mode = #tpu.pipeline_mode<synchronous>, transform_indices = @transform_3, window_bounds = array<i64: 16, 2>}, {pipeline_mode = #tpu.pipeline_mode<synchronous>, transform_indices = @transform_4, window_bounds = array<i64: 1, 16>}, {transform_indices = @transform_5, window_bounds = array<i64: 1, 16, 256>}]} {
    %c0 = arith.constant 0 : index
    %c0_0 = arith.constant 0 : index
    %c0_1 = arith.constant 0 : index
    %0 = vector.load %arg1[%c0, %c0_0, %c0_1] : memref<1x16x256xf32, #tpu.memory_space<vmem>>, vector<1x16x256xf32>
    %cst = arith.constant dense<0.000000e+00> : vector<1x16xf32>
    %1 = vector.multi_reduction <add>, %0, %cst [2] : vector<1x16x256xf32> to vector<1x16xf32>
    %cst_2 = arith.constant 3.906250e-03 : f32
    %2 = vector.broadcast %cst_2 : f32 to vector<1x16xf32>
    %3 = arith.mulf %1, %2 : vector<1x16xf32>
    %c0_3 = arith.constant 0 : index
    %c0_4 = arith.constant 0 : index
    %4 = vector.load %arg2[%c0_3, %c0_4] : memref<2x16xf32, #tpu.memory_space<vmem>>, vector<2x16xf32>
    %cst_5 = arith.constant dense<0.000000e+00> : vector<1x2xf32>
    %5 = tpu.matmul %3, %4, %cst_5 {dimension_numbers = #tpu.dot_dimension_numbers<[1], [1], [0], [0], [0, 0, 1, 0], [], []>} : vector<1x16xf32>, vector<2x16xf32>, vector<1x2xf32> -> vector<1x2xf32>
    %c0_6 = arith.constant 0 : index
    %c0_7 = arith.constant 0 : index
    %6 = vector.load %arg3[%c0_6, %c0_7] : memref<1x2xf32, #tpu.memory_space<vmem>>, vector<1x2xf32>
    %7 = arith.addf %5, %6 : vector<1x2xf32>
    %8 = arith.negf %7 : vector<1x2xf32>
    %9 = math.exp %8 : vector<1x2xf32>
    %cst_8 = arith.constant 1.000000e+00 : f32
    %10 = vector.broadcast %cst_8 : f32 to vector<1x2xf32>
    %11 = arith.addf %10, %9 : vector<1x2xf32>
    %12 = arith.divf %10, %11 : vector<1x2xf32>
    %13 = arith.mulf %7, %12 : vector<1x2xf32>
    %c0_9 = arith.constant 0 : index
    %c0_10 = arith.constant 0 : index
    %14 = vector.load %arg4[%c0_9, %c0_10] : memref<16x2xf32, #tpu.memory_space<vmem>>, vector<16x2xf32>
    %cst_11 = arith.constant dense<0.000000e+00> : vector<1x16xf32>
    %15 = tpu.matmul %13, %14, %cst_11 {dimension_numbers = #tpu.dot_dimension_numbers<[1], [1], [0], [0], [0, 0, 1, 0], [], []>} : vector<1x2xf32>, vector<16x2xf32>, vector<1x16xf32> -> vector<1x16xf32>
    %c0_12 = arith.constant 0 : index
    %c0_13 = arith.constant 0 : index
    %16 = vector.load %arg5[%c0_12, %c0_13] : memref<1x16xf32, #tpu.memory_space<vmem>>, vector<1x16xf32>
    %17 = arith.addf %15, %16 : vector<1x16xf32>
    %18 = arith.negf %17 : vector<1x16xf32>
    %19 = math.exp %18 : vector<1x16xf32>
    %cst_14 = arith.constant 1.000000e+00 : f32
    %20 = vector.broadcast %cst_14 : f32 to vector<1x16xf32>
    %21 = arith.addf %20, %19 : vector<1x16xf32>
    %22 = arith.divf %20, %21 : vector<1x16xf32>
    %c0_15 = arith.constant 0 : index
    %c0_16 = arith.constant 0 : index
    %c0_17 = arith.constant 0 : index
    %23 = vector.load %arg1[%c0_15, %c0_16, %c0_17] : memref<1x16x256xf32, #tpu.memory_space<vmem>>, vector<1x16x256xf32>
    %24 = vector.shape_cast %22 : vector<1x16xf32> to vector<1x16x1xf32>
    %25 = vector.broadcast %24 : vector<1x16x1xf32> to vector<1x16x256xf32>
    %26 = arith.mulf %23, %25 : vector<1x16x256xf32>
    %c0_18 = arith.constant 0 : index
    %c0_19 = arith.constant 0 : index
    %c0_20 = arith.constant 0 : index
    %27 = vector.load %arg6[%c0_18, %c0_19, %c0_20] : memref<1x16x256xf32, #tpu.memory_space<vmem>>, vector<1x16x256xf32>
    tpu.vector_store %arg6[%c0_18, %c0_19, %c0_20], %26 {strides = array<i32>} : memref<1x16x256xf32, #tpu.memory_space<vmem>>, vector<1x16x256xf32>,
    return
  }
  func.func @transform_0(%arg0: i32) -> (i32, i32, i32) {
    %c0_i32 = arith.constant 0 : i32
    %c0_i32_0 = arith.constant 0 : i32
    %c0_i32_1 = arith.constant 0 : i32
    return %arg0, %c0_i32, %c0_i32_0 : i32, i32, i32
  }
  func.func @transform_1(%arg0: i32) -> (i32, i32) {
    %c0_i32 = arith.constant 0 : i32
    %c0_i32_0 = arith.constant 0 : i32
    %c0_i32_1 = arith.constant 0 : i32
    return %c0_i32, %c0_i32_0 : i32, i32
  }
  func.func @transform_2(%arg0: i32) -> (i32, i32) {
    %c0_i32 = arith.constant 0 : i32
    %c0_i32_0 = arith.constant 0 : i32
    %c0_i32_1 = arith.constant 0 : i32
    return %c0_i32, %c0_i32_0 : i32, i32
  }
  func.func @transform_3(%arg0: i32) -> (i32, i32) {
    %c0_i32 = arith.constant 0 : i32
    %c0_i32_0 = arith.constant 0 : i32
    %c0_i32_1 = arith.constant 0 : i32
    return %c0_i32, %c0_i32_0 : i32, i32
  }
  func.func @transform_4(%arg0: i32) -> (i32, i32) {
    %c0_i32 = arith.constant 0 : i32
    %c0_i32_0 = arith.constant 0 : i32
    %c0_i32_1 = arith.constant 0 : i32
    return %c0_i32, %c0_i32_0 : i32, i32
  }
  func.func @transform_5(%arg0: i32) -> (i32, i32, i32) {
    %c0_i32 = arith.constant 0 : i32
    %c0_i32_0 = arith.constant 0 : i32
    %c0_i32_1 = arith.constant 0 : i32
    return %arg0, %c0_i32, %c0_i32_0 : i32, i32, i32
  }
}

</mosaic_0001>

<bundles_post_ra>
// kernel: tpu_custom_call.1
= control target key start
LH: loop header
LB: loop body
LE: loop exit
PB: predicated region body
PF: predicated region fallthrough
CT: control target
= control target key end

     0   :  { %10 = vsyncpa [#allocation3], 0  ;;  %s976_s0 = inlined_call_operand.hbm [shape: f32[2,16,256], index: 0, kind: input, shape index: {}]   ;;  %s977_s1 = inlined_call_operand.vmem [shape: f32[2,16], index: 1, kind: input, shape index: {}]   ;;  %s978_s2 = inlined_call_operand.vmem [shape: f32[1,2], index: 2, kind: input, shape index: {}]   ;;  %s979_s3 = inlined_call_operand.vmem [shape: f32[16,2], index: 3, kind: input, shape index: {}]   ;;  %s980_s4 = inlined_call_operand.vmem [shape: f32[1,16], index: 4, kind: input, shape index: {}]   ;;  %s981_s5 = inlined_call_operand.hbm [shape: f32[2,16,256], index: 5, kind: output, shape index: {}]  }
   0x1   :  { %12 = vsyncpa [#allocation3 + $0x1], 0 }
   0x2   :  { %13 = vsyncpa [#allocation4], 0 }
   0x3   :  { %15 = vsyncpa [#allocation4 + $0x1], 0  ;;  %s782_s18 = smov 0   ;;  %s784_s19 = smov 0  }
   0x4   :  { %s786_s20 = smov 0   ;;  %s788_s21 = smov 0  }
   0x5 LB: > { %s803_s22 = sadd.s32 4294967295, %s742_s21   ;;  %s550_s23 = sadd.s32 4294967294, %s742_s21   ;;  %s742_s21 = sphi %s788_s21, %s996_s21   ;;  %s738_s20 = sphi %s786_s20, %s995_s20   ;;  %s734_s19 = sphi %s784_s19, %s994_s19   ;;  %s730_s18 = sphi %s782_s18, %s993_s18  }
   0x6   : > { %s807_s24 = sadd.s32 1, %s742_s21   ;;  %s28_s25 = sadd.s32 1, %s738_s20 }
   0x7   : > { %s25_s26 = ssub.s32 %s742_s21, %s807_s24  ;;  %p35_p0 = scmp.ne.s32.totalorder %s738_s20, %s734_s19 }
   0x8   : > { %p26_p1 = scmp.eq.s32.totalorder %s25_s26, 0  ;;  %p36_p2 = scmp.eq.s32.totalorder %s742_s21, 0 }
   0x9   : > { %p41_p3 = scmp.ne.s32.totalorder %s734_s19, %s730_s18  ;;  %p42_p4 = scmp.eq.s32.totalorder %s803_s22, 0 }
   0xa   : > { %s819_s27 = scalar_select %p26_p1, %s738_s20, %s28_s25  }
   0xb   : > { %p821_p5 = por %p36_p2, %p35_p0  ;;  %p825_p6 = por %p42_p4, %p41_p3 }
   0xc   : > { %p149_p7 = scmp.eq.s32.totalorder %s803_s22, 1  ;;  %p155_p8 = scmp.eq.s32.totalorder %s550_s23, 1 }
   0xd   : > { %s985_s29 = scalar_select %p825_p6, 1, 0 }
   0xe   : > { %p602_p10 = scmp.lt.s32.totalorder %s742_s21, 2  ;;  %p832_p11 = por %p149_p7, %p35_p0 }
   0xf   : > { %p836_p12 = por %p155_p8, %p41_p3  ;;  %s187_s7 = sand.u32 1, %s738_s20  }
  0x10   : > { %s986_s30 = scalar_select %p832_p11, 1, 0 }
  0x11   : > { %s987_s6 = scalar_select %p836_p12, 1, 0 }
  0x12   : > { %s571_s8 = sshll.u32 %s742_s21, 9  ;;  %s553_s9 = sshll.u32 %s187_s7, 5 }
  0x13   : > { %s845_s12 = scalar_lea.hbm %s976_s0, %s571_s8  ;;  %s191_s13 = scalar_lea.vmem [#allocation2], %s553_s9 }
  0x14   : > { %s198_s14 = sshll.u32 %s191_s13, 4  ;;  %p849_p13 = pnand %p602_p10, %p821_p5  ;;  %s853_s14 = int_to_ptr.vmem [resolvable:$true] %s198_s14 }
  0x15   : > { %s855_s16 = scalar_lea.sflag [#allocation3], %s187_s7  ;;  %s650_s17 = scalar_lea.hbm %s845_s12, 512 }
  0x16   : > { %p651_p0 = scmp.ne.s32.totalorder %s845_s12, %s650_s17  ;;  %p652_p1 = pneg %p849_p13 }
  0x17   : > { %s655_s26 = scalar_lea.hbm %s976_s0, 1024  ;;  %p656_p4 = scmp.lt.s32.totalorder %s845_s12, %s976_s0 }
  0x18   : > { %p653_p2 = pnand %p652_p1, %p651_p0  ;;  %p657_p5 = scmp.lt.s32.totalorder %s655_s26, %s650_s17 }
  0x1a   : > { %p654_p3 = pneg %p653_p2  ;;  %p658_p7 = por %p657_p5, %p656_p4 }
  0x1c   : > { %p659_p8 = pnand %p658_p7, %p654_p3 }
  0x1e   : > { %662 = shalt.err (!%p659_p8)
}
  0x1f   : > { %s663_s7 = scalar_lea.vmem %s853_s14, 512  ;;  %s744_s9 = smov [#allocation2]  }
  0x20   : > { %p664_p10 = scmp.ne.s32.totalorder %s853_s14, %s663_s7  ;;  %s668_s10 = sshll.u32 %s744_s9, 4  ;;  %s669_s10 = int_to_ptr.vmem [resolvable:$false] %s668_s10 }
  0x21   : > { %s670_s11 = scalar_lea.vmem %s669_s10, 1024  ;;  %p671_p2 = scmp.lt.s32.totalorder %s853_s14, %s669_s10 }
  0x22   : > { %p666_p9 = pnand %p664_p10, %p652_p1  ;;  %p672_p12 = scmp.lt.s32.totalorder %s670_s11, %s663_s7 }
  0x24   : > { %p667_p0 = pneg %p666_p9  ;;  %p673_p11 = por %p672_p12, %p671_p2 }
  0x26   : > { %p674_p6 = pnand %p673_p11, %p667_p0 }
  0x28   : > { %677 = shalt.err (!%p674_p6)
}
  0x29   : > { %s745_s13 = smov 256   ;;  %s746_s17 = smov 16  }
  0x2a   : > { %597 = dma.hbm_to_vmem [thread:$0]  (!%p849_p13), %s845_s12, 512, %s853_s14, %s855_s16, %s745_s13, %s745_s13, %s746_s17  }
  0x2b   : > { %p556_p9 = scmp.ge.s32.totalorder %s742_s21, 1  ;;  %p206_p1 = scmp.lt.s32.totalorder %s742_s21, 3 }
  0x2d   : > { %p207_p3 = pnand %p556_p9, %p206_p1 }
  0x2e   : > { %s879_s23 = sand.u32 (!%p207_p3), 1, %s734_s19   ;;  %p989_p6 = scmp.ne.s32.totalorder (!%p207_p3), %s985_s29, 0 }
  0x2f   : > { %210 = sbr.rel (%p207_p3) target bundleno = 796 (0x31c), region = 40  ;;  %s557_s25 = sshll.u32 (!%p207_p3), %s879_s23, 5 }
  0x30   : > { %s213_s26 = scalar_lea.sflag (!%p207_p3), [#allocation3], %s879_s23  ;;  %s216_s28 = scalar_lea.vmem (!%p207_p3), [#allocation2], %s557_s25 }
  0x34   : > { %721 = dma.done.wait (%p989_p6), %s213_s26, 512  }
  0x35   : > { %723 = vsyncadd (%p989_p6), %s213_s26, 4294966784  ;;  %v889_v0 = vld [vmem:[%s216_s28] sm:$0xff]  ;;  %v891_v1 = vld [vmem:[%s216_s28 + $0x8] sm:$0xff]  ;;  %v747_v6 = vmov 0.0   ;;  %vm272_vm0 = vcmask 130048   ;;  %vm748_vm1 = vmmov 0   ;;  %v259_v8 = vlaneseq }
  0x36   : > { %v893_v2 = vld [vmem:[%s216_s28 + $0x10] sm:$0xff]  ;;  %v247_v3 = vadd.f32 %v891_v1, %v889_v0  ;;  %v897_v4 = vld [vmem:[%s216_s28 + $0x18] sm:$0xff]  ;;  %578 = vmatprep.subr.mxu0 %v747_v6  ;;  %v255_v7 = vld [vmem:[%s977_s1] sm:$0x3]  ;;  %583 = vmatprep.subr.mxu1 %v747_v6  ;;  %vm270_vm2 = vcmask 130112   ;;  %vm358_vm3 = vcmask 15360  }
  0x37   : > { %v250_v5 = vadd.f32 %v897_v4, %v893_v2  ;;  %579 = vmatpush3.xpose.msk.msra.mxu0 %vm272_vm0, %v255_v7  ;;  %580 = vmatprep.mubr.msk.f32.mxu0 %vm748_vm1, %v747_v6  ;;  %v260_v9 = vand.u32 127, %v259_v8  ;;  %v262_v10 = vshrl.u32 %v259_v8, 7  ;;  %v356_v21 = vld [vmem:[%s979_s3 + $0x8] sm:$0xff]  ;;  %v355_v22 = vld [vmem:[%s979_s3] sm:$0xff]  ;;  %s242_s13 = scalar_lea.vmem [#allocation5], %s557_s25  ;;  %s572_s26 = sshll.u32 %s803_s22, 9 }
  0x38   : > { %248 = vadd.xlane.f32.xlu0 %v247_v3  ;;  %587 = vmatprep.mubr.msk.f32.mxu1 %vm748_vm1, %v747_v6  ;;  %v256_v23 = vld [vmem:[%s978_s2] sm:$0x1]  ;;  %s477_s17 = sshll.u32 %s242_s13, 4  ;;  %s931_s25 = scalar_lea.hbm %s981_s5, %s572_s26  ;;  %s926_s17 = int_to_ptr.vmem [resolvable:$true] %s477_s17 }
  0x39   : > { %v265_v11 = vadd.s32 4294967288, %v260_v9  ;;  %v263_v13 = vsub.s32 %v260_v9, %v262_v10  ;;  %584 = vmatpush3.xpose.msk.msra.mxu1 %vm358_vm3, %v356_v21  ;;  %v357_v32 = vld [vmem:[%s980_s4] sm:$0x1]  ;;  %v446_v39 = vsub.s32 0, %v262_v10  ;;  %s464_s22 = scalar_lea.sflag [#allocation4], %s879_s23  ;;  %s678_s12 = scalar_lea.vmem %s926_s17, 512 }
  0x3a   : > { %585 = vmatprep.subr.mxu1 %v747_v6  ;;  %p679_p11 = scmp.ne.s32.totalorder %s926_s17, %s678_s12  ;;  %p990_p12 = scmp.ne.s32.totalorder %s986_s30, 0 }
  0x3b   : > { %v268_v15 = vsub.s32 %v265_v11, %v262_v10  ;;  %s749_s14 = smov [#allocation5]  }
  0x3c   : > { %251 = vadd.xlane.f32.xlu0 %v250_v5  ;;  %p680_p13 = pnand %p679_p11, %p990_p12  ;;  %s682_s15 = sshll.u32 %s749_s14, 4  ;;  %s683_s15 = int_to_ptr.vmem [resolvable:$false] %s682_s15 }
  0x3d   : > { %586 = vmatpush3.xpose.msk.msra.mxu1 %vm358_vm3, %v355_v22  ;;  %s684_s16 = scalar_lea.vmem %s683_s15, 1024  ;;  %p685_p5 = scmp.lt.s32.totalorder %s926_s17, %s683_s15 }
  0x3e   : > { %p681_p4 = pneg %p680_p13  ;;  %p686_p7 = scmp.lt.s32.totalorder %s684_s16, %s678_s12 }
  0x40   : > { %p687_p8 = por %p686_p7, %p685_p5 }
  0x42   : > { %p688_p10 = pnand %p687_p8, %p681_p4 }
  0xc1   : > { %v249_v12 = vpop.xlane.xlu0 %248 }
  0xc2   : > { %v253_v14 = vmul.f32 0.00390625, %v249_v12 }
  0xc4   : > { %v264_v18 = vrot.slane %v253_v14, %v263_v13 }
  0xc5   : > { %v252_v16 = vpop.xlane.xlu0 %251 }
  0xc6   : > { %v254_v17 = vmul.f32 0.00390625, %v252_v16 }
  0xc8   : > { %v269_v19 = vrot.slane %v254_v17, %v268_v15 }
  0xca   : > { %v271_v20 = vsel %vm270_vm2, %v269_v19, %v264_v18 }
  0xcb   : > { %581 = vmatmul.mubr.msk.f32.vlgmr.msra.gmra.mxu0 %vm272_vm0, %v271_v20 }
 0x18b   : > { %v344_v24 = vpop.f32.mrf.mxu0 }
 0x18c   : > { %v345_v25 = vadd.f32 %v344_v24, %v256_v23 }
 0x18d   : > { %v582_v26 = vpop.f32.mrf.mxu0 }
 0x18e   : > { %v561_v27 = vmul.f32 -1.442695, %v345_v25 }
 0x190   : > { %642 = vpow2.f32 %v561_v27 }
 0x19d   : > { %v643_v28 = vpop.eup %642 }
 0x19e   : > { %v351_v29 = vadd.f32 1.0, %v643_v28 }
 0x1a0   : > { %644 = vrcp.f32 %v351_v29 }
 0x1ad   : > { %v645_v30 = vpop.eup %644 }
 0x1ae   : > { %v354_v31 = vmul.f32 %v645_v30, %v345_v25 }
 0x1b0   : > { %588 = vmatmul.mubr.msk.f32.vlgmr.msra.gmra.mxu1 %vm358_vm3, %v354_v31 }
 0x270   : > { %v434_v33 = vpop.f32.mrf.mxu1 }
 0x271   : > { %v435_v34 = vadd.f32 %v434_v33, %v357_v32 }
 0x272   : > { %v589_v35 = vpop.f32.mrf.mxu1 }
 0x273   : > { %v565_v36 = vmul.f32 -1.442695, %v435_v34 }
 0x275   : > { %646 = vpow2.f32 %v565_v36 }
 0x282   : > { %v647_v37 = vpop.eup %646 }
 0x283   : > { %v441_v38 = vadd.f32 1.0, %v647_v37 }
 0x285   : > { %648 = vrcp.f32 %v441_v38 }
 0x292   : > { %v649_v40 = vpop.eup %648 }
 0x293   : > { %v447_v41 = vrot.slane %v649_v40, %v446_v39 }
 0x295   : > { %449 = vbcast.lane.b32.xlu1 %v447_v41, 256 }
 0x299   : > { %453 = vbcast.lane.b32.xlu1 %v447_v41, 264 }
 0x307   : > { %v450_v42 = vpop.permute.xlu1 %449 }
 0x308   : > { %v455_v43 = vmul.f32 %v450_v42, %v889_v0  ;;  %v456_v44 = vmul.f32 %v450_v42, %v891_v1 }
 0x30a   : > { %459 = vst [vmem:[%s242_s13] sm:$0xff] %v455_v43  ;;  %460 = vst [vmem:[%s242_s13 + $0x8] sm:$0xff] %v456_v44 }
 0x30b   : > { %v454_v45 = vpop.permute.xlu1 %453 }
 0x30c   : > { %v457_v46 = vmul.f32 %v454_v45, %v893_v2  ;;  %v458_v47 = vmul.f32 %v454_v45, %v897_v4 }
 0x30e   : > { %461 = vst [vmem:[%s242_s13 + $0x10] sm:$0xff] %v457_v46  ;;  %462 = vst [vmem:[%s242_s13 + $0x18] sm:$0xff] %v458_v47 }
 0x30f   : > { %691 = shalt.err (!%p688_p10)
}
 0x310   : > { %s692_s8 = scalar_lea.hbm %s931_s25, 512  ;;  %s696_s10 = scalar_lea.hbm %s981_s5, 1024 }
 0x311   : > { %p693_p0 = scmp.ne.s32.totalorder %s931_s25, %s692_s8  ;;  %p697_p1 = scmp.lt.s32.totalorder %s931_s25, %s981_s5 }
 0x312   : > { %p698_p3 = scmp.lt.s32.totalorder %s696_s10, %s692_s8 }
 0x313   : > { %p694_p2 = pnand %p693_p0, %p990_p12 }
 0x314   : > { %p699_p6 = por %p698_p3, %p697_p1 }
 0x315   : > { %p695_p9 = pneg %p694_p2 }
 0x317   : > { %p700_p11 = pnand %p699_p6, %p695_p9 }
 0x319   : > { %703 = shalt.err (!%p700_p11)
}
 0x31a   : > { %s750_s26 = smov 256   ;;  %s751_s28 = smov 16  }
 0x31b   : > { %592 = dma.vmem_to_hbm [thread:$0]  (%p990_p12), %s926_s17, 512, %s931_s25, %s464_s22, %s750_s26, %s750_s26, %s751_s28  }
 0x31c PF: > { %s492_s29 = sand.u32 1, %s730_s18   ;;  %p991_p13 = scmp.ne.s32.totalorder %s987_s6, 0 }
 0x31d   : > { %p992_p4 = scmp.ge.s32.totalorder %s742_s21, 2  ;;  %s493_s12 = scalar_lea.sflag [#allocation4], %s492_s29 }
 0x31f   : > { %p599_p5 = pnand %p992_p4, %p991_p13 }
 0x321   : > { %p600_p7 = pneg %p599_p5 }
 0x323   : > { %725 = dma.done.wait (%p600_p7), %s493_s12, 512  }
 0x324   : > { %727 = vsyncadd (%p600_p7), %s493_s12, 4294966784  ;;  %p18_p8 = scmp.ge.s32.totalorder %s807_s24, 4   ;;  %s993_s18 = smov %s734_s19 }
 0x325   : > { %s994_s19 = smov %s738_s20  ;;  %s995_s20 = smov %s819_s27 }
 0x326   : > { %s996_s21 = smov %s807_s24  ;;  %20 = sbr.rel (!%p18_p8) target bundleno = 5 (0x5), region = 85 }
 0x32b   :  { %498 = vsyncpa [#allocation3], 1 }
 0x32c   :  { %500 = vsyncpa [#allocation3 + $0x1], 1 }
 0x32d   :  { %501 = vsyncpa [#allocation4], 1 }
 0x32e   :  { %503 = vsyncpa [#allocation4 + $0x1], 1 }

</bundles_post_ra>
